<compile_context>
chip_gen: v6e
topology: v6e:2x2x1
jax: 0.10.0
libtpu: 0.0.40
codegen_flags: <defaults>
</compile_context>

<pallas_src>
import functools

import jax
import jax.numpy as jnp
from jax.experimental import pallas as pl
from jax.experimental.pallas import tpu as pltpu


def _task_model_kernel(x_ref, wt_ref, b_ref, pred_ref, act_ref):
    """Per (batch, column-tile) grid step.

    Layout: channels on sublanes, pixels on lanes.
      x_ref    : (C_in,  T)     input pixels of this tile (NCHW-native view)
      wt_ref   : (C_out, C_in)  transposed head weight
      b_ref    : (C_out, 1)     bias column
      pred_ref : (C_out, T)     unactivated logits
      act_ref  : (C_out, T)     channel softmax of the logits
    """
    x = x_ref[...].astype(jnp.float32)
    wt = wt_ref[...].astype(jnp.float32)
    b = b_ref[...].astype(jnp.float32)

    c_in, t = x.shape
    c_out = wt.shape[0]

    if c_in * c_out <= 1024:
        # Tiny channel counts: unrolled outer-product FMA on the VPU; avoids
        # pushing a heavily padded (4x8) tile through the MXU every step.
        logits = jnp.broadcast_to(b, (c_out, t))
        for c in range(c_in):
            logits = logits + wt[:, c:c + 1] * x[c:c + 1, :]
    else:
        # TODO(synk): for very large C_out, tile the weight along C_out (and use
        # a two-pass channel softmax) instead of replicating the full block,
        # to stay within v7x's 64 MiB VMEM.
        logits = jnp.dot(wt, x, preferred_element_type=jnp.float32) + b

    pred_ref[...] = logits.astype(pred_ref.dtype)

    # Channel softmax over the sublane (channel) axis; pixels stay lane-dense.
    m = jnp.max(logits, axis=0, keepdims=True)          # (1, T)  XLU
    e = jnp.exp(logits - m)                              # EUP
    denom = jnp.sum(e, axis=0, keepdims=True)            # (1, T)  XLU
    inv = pl.reciprocal(denom, approx=True)              # EUP, no VALU divide
    act_ref[...] = (e * inv).astype(act_ref.dtype)


def _round_up(x, m):
    return (x + m - 1) // m * m


@functools.partial(jax.jit, static_argnames=("tile_cols",))
def task_model_forward(x_nchw, weight, bias, *, tile_cols=2048):
    """Forward pass of the task model.

    Args:
      x_nchw: [N, C_in, H, W] float32 input (PyTorch NCHW convention).
      weight: [C_in, C_out] pointwise head weight.
      bias:   [C_out] bias.

    Returns:
      (pred, activated_pred), both [N, C_out, H, W] float32.
    """
    n, c_in, h, w = x_nchw.shape
    c_out = weight.shape[1]
    hw = h * w

    # Consume NCHW natively as (N, C_in, H*W): pixels on the lane axis.
    x3 = x_nchw.reshape(n, c_in, hw)

    # Column tile: multiple of 128, clipped to the (padded) spatial extent.
    tile = min(tile_cols, _round_up(hw, 128))
    hw_p = _round_up(hw, tile)
    if hw_p != hw:
        x3 = jnp.pad(x3, ((0, 0), (0, 0), (0, hw_p - hw)))

    wt = weight.T                    # (C_out, C_in)
    b2 = bias.reshape(c_out, 1)      # (C_out, 1)

    grid = (n, hw_p // tile)

    cost = pl.CostEstimate(
        flops=2 * n * hw_p * c_in * c_out + 4 * n * hw_p * c_out,
        transcendentals=n * hw_p * (c_out + 1),
        bytes_accessed=4 * (n * hw_p * c_in + 2 * n * hw_p * c_out
                            + c_in * c_out + c_out),
    )

    pred3, act3 = pl.pallas_call(
        _task_model_kernel,
        out_shape=(
            jax.ShapeDtypeStruct((n, c_out, hw_p), jnp.float32),
            jax.ShapeDtypeStruct((n, c_out, hw_p), jnp.float32),
        ),
        grid_spec=pltpu.PrefetchScalarGridSpec(
            num_scalar_prefetch=0,
            grid=grid,
            in_specs=[
                pl.BlockSpec((None, c_in, tile), lambda i, j: (i, 0, j)),  # x tile
                pl.BlockSpec((c_out, c_in), lambda i, j: (0, 0)),          # weight.T
                pl.BlockSpec((c_out, 1), lambda i, j: (0, 0)),             # bias col
            ],
            out_specs=[
                pl.BlockSpec((None, c_out, tile), lambda i, j: (i, 0, j)),
                pl.BlockSpec((None, c_out, tile), lambda i, j: (i, 0, j)),
            ],
        ),
        compiler_params=pltpu.CompilerParams(
            dimension_semantics=("parallel", "parallel")),
        cost_estimate=cost,
    )(x3, wt, b2)

    if hw_p != hw:
        pred3 = pred3[:, :, :hw]
        act3 = act3[:, :, :hw]
    pred = pred3.reshape(n, c_out, h, w)
    act = act3.reshape(n, c_out, h, w)
    return pred, act


def task_model_apply(inp, weight, bias):
    """Mirrors TaskModel.forward(inp) -> (resulter, debugger)."""
    assert isinstance(inp, tuple) and len(inp) >= 1, "inp must be a tuple of inputs"
    x = inp[0]
    pred, activated_pred = task_model_forward(x, weight, bias)
    resulter = {"pred": pred, "activated_pred": activated_pred}
    debugger = {}
    return resulter, debugger


if __name__ == "__main__":
    key = jax.random.PRNGKey(0)
    k_x, k_w, k_b = jax.random.split(key, 3)

    N, C_IN, H, W = 2, 4, 16, 16
    C_OUT = 8

    x = jax.random.normal(k_x, (N, C_IN, H, W), dtype=jnp.float32)
    weight = jax.random.normal(k_w, (C_IN, C_OUT), dtype=jnp.float32) * 0.1
    bias = jax.random.normal(k_b, (C_OUT,), dtype=jnp.float32) * 0.01

    resulter, debugger = task_model_apply((x,), weight, bias)
    pred = jax.block_until_ready(resulter["pred"])
    act = jax.block_until_ready(resulter["activated_pred"])

    # Pure-JAX reference (exact elementwise math — no MXU precision ambiguity).
    ref_logits = (x[:, :, None, :, :] * weight[None, :, :, None, None]).sum(axis=1)
    ref_logits = ref_logits + bias[None, :, None, None]
    ref_act = jax.nn.softmax(ref_logits, axis=1)

    assert pred.shape == (N, C_OUT, H, W) and act.shape == (N, C_OUT, H, W)
    assert jnp.allclose(pred, ref_logits, atol=1e-4), \
        float(jnp.max(jnp.abs(pred - ref_logits)))
    # activated_pred uses the EUP approximate reciprocal -> slightly looser tol.
    assert jnp.allclose(act, ref_act, atol=2e-3), \
        float(jnp.max(jnp.abs(act - ref_act)))

    print("KERNEL_OK")
</pallas_src>

<mosaic_0001>
module attributes {stable_mosaic.version = 11 : i64} {
  func.func @_task_model_kernel(%arg0: i32, %arg1: i32, %arg2: memref<1x4x256xf32, #tpu.memory_space<vmem>>, %arg3: memref<8x4xf32, #tpu.memory_space<vmem>>, %arg4: memref<8x1xf32, #tpu.memory_space<vmem>>, %arg5: memref<1x8x256xf32, #tpu.memory_space<vmem>>, %arg6: memref<1x8x256xf32, #tpu.memory_space<vmem>>) attributes {dimension_semantics = [#tpu.dimension_semantics<parallel>, #tpu.dimension_semantics<parallel>], iteration_bounds = array<i64: 2, 1>, scalar_prefetch = 0 : i64, scratch_operands = 0 : i64, tpu.core_type = #tpu.core_type<tc>, window_params = [{transform_indices = @transform_0, window_bounds = array<i64: 1, 4, 256>}, {pipeline_mode = #tpu.pipeline_mode<synchronous>, transform_indices = @transform_1, window_bounds = array<i64: 8, 4>}, {pipeline_mode = #tpu.pipeline_mode<synchronous>, transform_indices = @transform_2, window_bounds = array<i64: 8, 1>}, {transform_indices = @transform_3, window_bounds = array<i64: 1, 8, 256>}, {transform_indices = @transform_4, window_bounds = array<i64: 1, 8, 256>}]} {
    %c0 = arith.constant 0 : index
    %c0_0 = arith.constant 0 : index
    %c0_1 = arith.constant 0 : index
    %0 = vector.load %arg2[%c0, %c0_0, %c0_1] : memref<1x4x256xf32, #tpu.memory_space<vmem>>, vector<1x4x256xf32>
    %1 = vector.shape_cast %0 : vector<1x4x256xf32> to vector<4x256xf32>
    %c0_2 = arith.constant 0 : index
    %c0_3 = arith.constant 0 : index
    %2 = vector.load %arg3[%c0_2, %c0_3] : memref<8x4xf32, #tpu.memory_space<vmem>>, vector<8x4xf32>
    %c0_4 = arith.constant 0 : index
    %c0_5 = arith.constant 0 : index
    %3 = vector.load %arg4[%c0_4, %c0_5] : memref<8x1xf32, #tpu.memory_space<vmem>>, vector<8x1xf32>
    %4 = vector.shape_cast %3 : vector<8x1xf32> to vector<8x1xf32>
    %5 = vector.broadcast %4 : vector<8x1xf32> to vector<8x256xf32>
    %6 = vector.extract_strided_slice %2 {offsets = [0, 0], sizes = [8, 1], strides = [1, 1]} : vector<8x4xf32> to vector<8x1xf32>
    %7 = vector.extract_strided_slice %1 {offsets = [0, 0], sizes = [1, 256], strides = [1, 1]} : vector<4x256xf32> to vector<1x256xf32>
    %8 = vector.broadcast %6 : vector<8x1xf32> to vector<8x256xf32>
    %9 = vector.broadcast %7 : vector<1x256xf32> to vector<8x256xf32>
    %10 = arith.mulf %8, %9 : vector<8x256xf32>
    %11 = arith.addf %5, %10 : vector<8x256xf32>
    %12 = vector.extract_strided_slice %2 {offsets = [0, 1], sizes = [8, 1], strides = [1, 1]} : vector<8x4xf32> to vector<8x1xf32>
    %13 = vector.extract_strided_slice %1 {offsets = [1, 0], sizes = [1, 256], strides = [1, 1]} : vector<4x256xf32> to vector<1x256xf32>
    %14 = vector.broadcast %12 : vector<8x1xf32> to vector<8x256xf32>
    %15 = vector.broadcast %13 : vector<1x256xf32> to vector<8x256xf32>
    %16 = arith.mulf %14, %15 : vector<8x256xf32>
    %17 = arith.addf %11, %16 : vector<8x256xf32>
    %18 = vector.extract_strided_slice %2 {offsets = [0, 2], sizes = [8, 1], strides = [1, 1]} : vector<8x4xf32> to vector<8x1xf32>
    %19 = vector.extract_strided_slice %1 {offsets = [2, 0], sizes = [1, 256], strides = [1, 1]} : vector<4x256xf32> to vector<1x256xf32>
    %20 = vector.broadcast %18 : vector<8x1xf32> to vector<8x256xf32>
    %21 = vector.broadcast %19 : vector<1x256xf32> to vector<8x256xf32>
    %22 = arith.mulf %20, %21 : vector<8x256xf32>
    %23 = arith.addf %17, %22 : vector<8x256xf32>
    %24 = vector.extract_strided_slice %2 {offsets = [0, 3], sizes = [8, 1], strides = [1, 1]} : vector<8x4xf32> to vector<8x1xf32>
    %25 = vector.extract_strided_slice %1 {offsets = [3, 0], sizes = [1, 256], strides = [1, 1]} : vector<4x256xf32> to vector<1x256xf32>
    %26 = vector.broadcast %24 : vector<8x1xf32> to vector<8x256xf32>
    %27 = vector.broadcast %25 : vector<1x256xf32> to vector<8x256xf32>
    %28 = arith.mulf %26, %27 : vector<8x256xf32>
    %29 = arith.addf %23, %28 : vector<8x256xf32>
    %c0_6 = arith.constant 0 : index
    %c0_7 = arith.constant 0 : index
    %c0_8 = arith.constant 0 : index
    %30 = vector.load %arg5[%c0_6, %c0_7, %c0_8] : memref<1x8x256xf32, #tpu.memory_space<vmem>>, vector<1x8x256xf32>
    %31 = vector.shape_cast %30 : vector<1x8x256xf32> to vector<8x256xf32>
    %32 = vector.shape_cast %29 : vector<8x256xf32> to vector<1x8x256xf32>
    tpu.vector_store %arg5[%c0_6, %c0_7, %c0_8], %32 {strides = array<i32>} : memref<1x8x256xf32, #tpu.memory_space<vmem>>, vector<1x8x256xf32>,
    %cst = arith.constant dense<0xFF800000> : vector<256xf32>
    %33 = vector.multi_reduction <maximumf>, %29, %cst [0] : vector<8x256xf32> to vector<256xf32>
    %34 = vector.shape_cast %33 : vector<256xf32> to vector<1x256xf32>
    %35 = vector.broadcast %34 : vector<1x256xf32> to vector<8x256xf32>
    %36 = arith.subf %29, %35 : vector<8x256xf32>
    %37 = math.exp %36 : vector<8x256xf32>
    %cst_9 = arith.constant dense<0.000000e+00> : vector<256xf32>
    %38 = vector.multi_reduction <add>, %37, %cst_9 [0] : vector<8x256xf32> to vector<256xf32>
    %39 = vector.shape_cast %38 : vector<256xf32> to vector<1x256xf32>
    %40 = tpu.reciprocal %39 {approx = true} : vector<1x256xf32> -> vector<1x256xf32>
    %41 = vector.broadcast %40 : vector<1x256xf32> to vector<8x256xf32>
    %42 = arith.mulf %37, %41 : vector<8x256xf32>
    %c0_10 = arith.constant 0 : index
    %c0_11 = arith.constant 0 : index
    %c0_12 = arith.constant 0 : index
    %43 = vector.load %arg6[%c0_10, %c0_11, %c0_12] : memref<1x8x256xf32, #tpu.memory_space<vmem>>, vector<1x8x256xf32>
    %44 = vector.shape_cast %43 : vector<1x8x256xf32> to vector<8x256xf32>
    %45 = vector.shape_cast %42 : vector<8x256xf32> to vector<1x8x256xf32>
    tpu.vector_store %arg6[%c0_10, %c0_11, %c0_12], %45 {strides = array<i32>} : memref<1x8x256xf32, #tpu.memory_space<vmem>>, vector<1x8x256xf32>,
    return
  }
  func.func @transform_0(%arg0: i32, %arg1: i32) -> (i32, i32, i32) {
    %c0_i32 = arith.constant 0 : i32
    %c0_i32_0 = arith.constant 0 : i32
    return %arg0, %c0_i32, %arg1 : i32, i32, i32
  }
  func.func @transform_1(%arg0: i32, %arg1: i32) -> (i32, i32) {
    %c0_i32 = arith.constant 0 : i32
    %c0_i32_0 = arith.constant 0 : i32
    %c0_i32_1 = arith.constant 0 : i32
    return %c0_i32, %c0_i32_0 : i32, i32
  }
  func.func @transform_2(%arg0: i32, %arg1: i32) -> (i32, i32) {
    %c0_i32 = arith.constant 0 : i32
    %c0_i32_0 = arith.constant 0 : i32
    %c0_i32_1 = arith.constant 0 : i32
    return %c0_i32, %c0_i32_0 : i32, i32
  }
  func.func @transform_3(%arg0: i32, %arg1: i32) -> (i32, i32, i32) {
    %c0_i32 = arith.constant 0 : i32
    %c0_i32_0 = arith.constant 0 : i32
    return %arg0, %c0_i32, %arg1 : i32, i32, i32
  }
  func.func @transform_4(%arg0: i32, %arg1: i32) -> (i32, i32, i32) {
    %c0_i32 = arith.constant 0 : i32
    %c0_i32_0 = arith.constant 0 : i32
    return %arg0, %c0_i32, %arg1 : i32, i32, i32
  }
}

</mosaic_0001>

<bundles_post_ra>
// kernel: task_model_forward.1
= control target key start
LH: loop header
LB: loop body
LE: loop exit
PB: predicated region body
PF: predicated region fallthrough
CT: control target
= control target key end

     0   :  { %s659_s15 = smov 0   ;;  %s661_s16 = smov 0   ;;  %s709_s0 = inlined_call_operand.vmem [shape: f32[2,4,256], index: 0, kind: input, shape index: {}]   ;;  %s710_s1 = inlined_call_operand.vmem [shape: f32[8,4], index: 1, kind: input, shape index: {}]   ;;  %s711_s2 = inlined_call_operand.vmem [shape: f32[8,1], index: 2, kind: input, shape index: {}]   ;;  %s712_s3 = inlined_call_operand.vmem [shape: f32[2,8,256], index: 3, kind: output, shape index: {0}]   ;;  %s713_s4 = inlined_call_operand.vmem [shape: f32[2,8,256], index: 4, kind: output, shape index: {1}]  }
   0x1   :  { %s663_s17 = smov 0  }
   0x2 LB: > { %s27_s18 = sadd.s32 1, %s624_s16  ;;  %p554_p0 = scmp.ge.s32.totalorder %s628_s17, 1  ;;  %s628_s17 = sphi %s663_s17, %s15_s17   ;;  %s624_s16 = sphi %s661_s16, %s715_s16   ;;  %s620_s15 = sphi %s659_s15, %s714_s15  }
   0x3   : > { %p29_p1 = scmp.ge.s32.totalorder %s27_s18, 2  ;;  %p188_p2 = scmp.lt.s32.totalorder %s628_s17, 3 }
   0x5   : > { %s717_s18 = smov (%p29_p1, %s27_s18), 0  ;;  %p189_p3 = pnand %p554_p0, %p188_p2 }
   0x6   : > { %p232_p4 = scmp.lt.s32.totalorder (!%p189_p3), %s620_s15, 1 }
   0x7   : > { %192 = sbr.rel (%p189_p3) target bundleno = 211 (0xd3), region = 32 }
   0xc   : > { %v262_v0 = vld [vmem:[%s710_s1] sm:$0xff]  ;;  %v630_v1 = vmov 0   ;;  %v631_v2 = vmov 1   ;;  %v632_v4 = vmov 2   ;;  %v633_v5 = vmov 3   ;;  %s719_s15 = smov (!%p232_p4, %s620_s15), 1 }
   0xd   : > { %594 = vset.pattern.permute.xlu0 %v630_v1  ;;  %595 = vset.pattern.permute.xlu1 %v631_v2  ;;  %v263_v3 = vld [vmem:[%s711_s2] sm:$0xff]  ;;  %v275_v6 = vlaneseq  ;;  %s563_s23 = sshll.u32 %s719_s15, 3  ;;  %s564_s27 = sshll.u32 %s719_s15, 4 }
   0xe   : > { %271 = vperm.xlu0 %594, %v262_v0   ;;  %298 = vperm.xlu1 %595, %v262_v0   ;;  %s239_s26 = scalar_lea.vmem %s709_s0, %s563_s23  ;;  %s249_s30 = scalar_lea.vmem %s712_s3, %s564_s27 }
   0xf   : > { %v276_v7 = vshrl.u32 %v275_v6, 7  ;;  %v261_v10 = vld [vmem:[%s239_s26] sm:$0xff]  ;;  %s259_s7 = scalar_lea.vmem %s713_s4, %s564_s27 }
  0x11   : > { %v277_v8 = vsub.s32 0, %v276_v7  ;;  %v281_v9 = vsub.s32 4, %v276_v7  ;;  %v303_v11 = vsub.s32 1, %v276_v7  ;;  %v307_v12 = vsub.s32 5, %v276_v7 }
  0x12   : > { %266 = vperm.xlu0 %594, %v263_v3   ;;  %596 = vset.pattern.permute.xlu1 %v632_v4  ;;  %v329_v13 = vsub.s32 2, %v276_v7  ;;  %v333_v14 = vsub.s32 6, %v276_v7  ;;  %v355_v21 = vsub.s32 3, %v276_v7  ;;  %v359_v22 = vsub.s32 7, %v276_v7 }
  0x13   : > { %324 = vperm.xlu1 %596, %v262_v0   ;;  %v278_v15 = vrot.slane %v261_v10, %v277_v8  ;;  %v282_v16 = vrot.slane %v261_v10, %v281_v9  ;;  %v304_v17 = vrot.slane %v261_v10, %v303_v11  ;;  %v308_v18 = vrot.slane %v261_v10, %v307_v12 }
  0x14   : > { %v330_v19 = vrot.slane %v261_v10, %v329_v13  ;;  %v334_v20 = vrot.slane %v261_v10, %v333_v14  ;;  %v356_v31 = vrot.slane %v261_v10, %v355_v21  ;;  %v360_v32 = vrot.slane %v261_v10, %v359_v22 }
  0x15   : > { %v288_v23 = vrot.slane %v278_v15, %v277_v8  ;;  %v292_v24 = vrot.slane %v282_v16, %v277_v8  ;;  %v314_v27 = vrot.slane %v304_v17, %v303_v11  ;;  %v318_v28 = vrot.slane %v308_v18, %v303_v11 }
  0x16   : > { %597 = vset.pattern.permute.xlu0 %v633_v5  ;;  %v340_v29 = vrot.slane %v330_v19, %v329_v13  ;;  %v344_v30 = vrot.slane %v334_v20, %v329_v13  ;;  %v366_v43 = vrot.slane %v356_v31, %v355_v21  ;;  %v370_v44 = vrot.slane %v360_v32, %v355_v21 }
  0x17   : > { %350 = vperm.xlu0 %597, %v262_v0  }
  0x89   : > { %v272_v25 = vpop.permute.xlu0 %271  ;;  %v299_v26 = vpop.permute.xlu1 %298 }
  0x8a   : > { %v293_v33 = vmul.f32 %v288_v23, %v272_v25  ;;  %v294_v34 = vmul.f32 %v292_v24, %v272_v25  ;;  %v319_v36 = vmul.f32 %v314_v27, %v299_v26  ;;  %v320_v37 = vmul.f32 %v318_v28, %v299_v26 }
  0x8d   : > { %v267_v35 = vpop.permute.xlu0 %266 }
  0x8e   : > { %v295_v38 = vadd.f32 %v293_v33, %v267_v35  ;;  %v296_v39 = vadd.f32 %v294_v34, %v267_v35  ;;  %v325_v40 = vpop.permute.xlu1 %324 }
  0x8f   : > { %v345_v41 = vmul.f32 %v340_v29, %v325_v40  ;;  %v346_v42 = vmul.f32 %v344_v30, %v325_v40 }
  0x90   : > { %v321_v45 = vadd.f32 %v319_v36, %v295_v38  ;;  %v322_v46 = vadd.f32 %v320_v37, %v296_v39 }
  0x92   : > { %v347_v47 = vadd.f32 %v345_v41, %v321_v45  ;;  %v348_v48 = vadd.f32 %v346_v42, %v322_v46  ;;  %v351_v49 = vpop.permute.xlu0 %350 }
  0x93   : > { %v371_v50 = vmul.f32 %v366_v43, %v351_v49  ;;  %v372_v51 = vmul.f32 %v370_v44, %v351_v49 }
  0x95   : > { %v373_v52 = vadd.f32 %v371_v50, %v347_v47  ;;  %v374_v53 = vadd.f32 %v372_v51, %v348_v48 }
  0x97   : > { %375 = vst [vmem:[%s249_s30] sm:$0xff] %v373_v52  ;;  %376 = vst [vmem:[%s249_s30 + $0x8] sm:$0xff] %v374_v53  ;;  %v377_v54 = vrot.slane %v373_v52, 4  ;;  %v383_v55 = vrot.slane %v374_v53, 4 }
  0x99   : > { %v378_v56 = vmax.f32 %v373_v52, %v377_v54  ;;  %v384_v57 = vmax.f32 %v374_v53, %v383_v55 }
  0x9b   : > { %v379_v58 = vrot.slane %v378_v56, 2  ;;  %v385_v59 = vrot.slane %v384_v57, 2 }
  0x9d   : > { %v380_v60 = vmax.f32 %v378_v56, %v379_v58  ;;  %v386_v61 = vmax.f32 %v384_v57, %v385_v59 }
  0x9f   : > { %v381_v62 = vrot.slane %v380_v60, 1  ;;  %v387_v63 = vrot.slane %v386_v61, 1 }
  0xa1   : > { %v382_v0 = vmax.f32 %v380_v60, %v381_v62  ;;  %v388_v1 = vmax.f32 %v386_v61, %v387_v63 }
  0xa3   : > { %v389_v2 = vsub.f32 %v373_v52, %v382_v0  ;;  %v390_v3 = vsub.f32 %v374_v53, %v388_v1 }
  0xa5   : > { %v391_v4 = vmul.f32 1.442695, %v389_v2  ;;  %v393_v5 = vmul.f32 1.442695, %v390_v3 }
  0xa7   : > { %598 = vpow2.f32 %v391_v4 }
  0xa8   : > { %600 = vpow2.f32 %v393_v5 }
  0xb4   : > { %v599_v6 = vpop.eup %598 }
  0xb5   : > { %v601_v7 = vpop.eup %600  ;;  %v395_v8 = vrot.slane %v599_v6, 4 }
  0xb6   : > { %v401_v9 = vrot.slane %v601_v7, 4 }
  0xb7   : > { %v396_v10 = vadd.f32 %v599_v6, %v395_v8 }
  0xb8   : > { %v402_v11 = vadd.f32 %v601_v7, %v401_v9 }
  0xb9   : > { %v397_v12 = vrot.slane %v396_v10, 2 }
  0xba   : > { %v403_v13 = vrot.slane %v402_v11, 2 }
  0xbb   : > { %v398_v14 = vadd.f32 %v397_v12, %v396_v10 }
  0xbc   : > { %v404_v15 = vadd.f32 %v403_v13, %v402_v11 }
  0xbd   : > { %v399_v16 = vrot.slane %v398_v14, 1 }
  0xbe   : > { %v405_v17 = vrot.slane %v404_v15, 1 }
  0xbf   : > { %v400_v18 = vadd.f32 %v399_v16, %v398_v14 }
  0xc0   : > { %v406_v19 = vadd.f32 %v405_v17, %v404_v15 }
  0xc1   : > { %602 = vrcp.f32 %v400_v18 }
  0xc2   : > { %604 = vrcp.f32 %v406_v19 }
  0xce   : > { %v603_v20 = vpop.eup %602 }
  0xcf   : > { %v605_v21 = vpop.eup %604  ;;  %v409_v22 = vmul.f32 %v603_v20, %v599_v6 }
  0xd0   : > { %v410_v23 = vmul.f32 %v605_v21, %v601_v7 }
  0xd1   : > { %411 = vst [vmem:[%s259_s7] sm:$0xff] %v409_v22 }
  0xd2   : > { %412 = vst [vmem:[%s259_s7 + $0x8] sm:$0xff] %v410_v23 }
  0xd3 PF: > { %s15_s17 = sadd.s32 1, %s628_s17   ;;  %s714_s15 = smov %s624_s16 }
  0xd4   : > { %p12_p5 = scmp.ge.s32.totalorder %s15_s17, 4   ;;  %s715_s16 = smov %s717_s18 }
  0xd6   :  { %14 = sbr.rel (!%p12_p5) target bundleno = 2 (0x2), region = 74 }

</bundles_post_ra>
